<compile_context>
chip_gen: v6e
topology: v6e:2x2x1
jax: 0.10.0
libtpu: 0.0.40
codegen_flags: <defaults>
</compile_context>

<pallas_src>
import functools

import jax
import jax.numpy as jnp
from jax.experimental import pallas as pl
from jax.experimental.pallas import tpu as pltpu

_LANE = 128
_SUBLANE = 8


def _round_up(x, m):
    return ((x + m - 1) // m) * m


def _cdiv(a, b):
    return -(-a // b)


def _actor_kernel(x_ref, w_ref, b_ref, out_ref):
    """Fused MLP forward on one (bm, in_dim) batch tile.

    x_ref:   (bm, in_dim)        raw input block (not lane-padded in HBM).
    w_ref:   (n_layers, P, P)    packed, zero-padded weights (in, out) per layer.
    b_ref:   (8, P)              packed, zero-padded biases, one row per layer.
    out_ref: (bm, n_actions)     narrow output block (only real action lanes).

    4x (matmul + bias + relu), then matmul + bias + tanh.  All matmuls hit the
    MXU with f32 accumulation; padded lanes carry exact zeros throughout.
    """
    n_layers, P, _ = w_ref.shape
    x = x_ref[...]
    bm, in_dim = x.shape
    if in_dim < P:
        # Zero-extend to 128 lanes in vregs (exact-math padding; padded weight
        # rows are also zero, so the dot is unchanged).
        x = jnp.concatenate(
            [x, jnp.zeros((bm, P - in_dim), dtype=x.dtype)], axis=-1)

    h = x
    for i in range(n_layers - 1):
        h = jnp.maximum(
            jnp.dot(h, w_ref[i], preferred_element_type=jnp.float32)
            + b_ref[i:i + 1, :],
            0.0)

    last = n_layers - 1
    pi = jnp.tanh(
        jnp.dot(h, w_ref[last], preferred_element_type=jnp.float32)
        + b_ref[last:last + 1, :])

    n_actions = out_ref.shape[-1]
    out_ref[...] = pi[:, :n_actions].astype(out_ref.dtype)


def pack_actor_params(params):
    """Pack raw (in,out) weights and (1,out) biases into lane-padded slabs.

    Returns:
      w_slab: (n_layers, P, P) float32, zero-padded.
      b_slab: (8, P) float32 (rows 0..n_layers-1 are the biases, rest zero).
    """
    ws = [params["w1"], params["w2"], params["w3"], params["w4"], params["wp"]]
    bs = [params["b1"], params["b2"], params["b3"], params["b4"], params["bp"]]
    dims = [ws[0].shape[0]] + [w.shape[1] for w in ws]
    P = max(_round_up(int(d), _LANE) for d in dims)
    n_layers = len(ws)

    w_slab = jnp.zeros((n_layers, P, P), jnp.float32)
    b_slab = jnp.zeros((_round_up(n_layers, _SUBLANE), P), jnp.float32)
    for i, (w, b) in enumerate(zip(ws, bs)):
        w_slab = w_slab.at[i, :w.shape[0], :w.shape[1]].set(
            w.astype(jnp.float32))
        b_slab = b_slab.at[i, :b.shape[-1]].set(
            b.reshape(-1).astype(jnp.float32))
    return w_slab, b_slab


@functools.partial(jax.jit, static_argnames=("n_actions",))
def actor_forward(state, w_slab, b_slab, n_actions):
    """Run the fused ActorNetwork forward pass on packed params."""
    batch, in_dim = state.shape
    n_layers, P, _ = w_slab.shape

    # --- batch-tile selection ------------------------------------------------
    # Big tiles amortize the ~0.35us/step grid overhead and the per-step MXU
    # weight pushes; cap at 512 rows (footprint is still tiny vs. any VMEM).
    # Target >=2 grid steps when the batch permits so v7x can shard the
    # "parallel" axis across both TensorCores, and pick bm from cdiv(batch,
    # n_steps) so the tail tile is never mostly padding.
    cap = 512
    min_steps = 2 if batch >= 2 * _SUBLANE else 1
    n_steps = max(min_steps, _cdiv(batch, cap))
    bm = _round_up(_cdiv(batch, n_steps), _SUBLANE)
    padded_batch = bm * n_steps

    # Only row padding (exact zeros) in the wrapper; lane padding happens
    # in-kernel to avoid an extra HBM pass over a batch x 128 array.
    x = state.astype(jnp.float32)
    if padded_batch != batch:
        x = jnp.pad(x, ((0, padded_batch - batch), (0, 0)))

    # Advisory scheduler hint; intentionally counts padded rows/lanes.
    flops = 2 * padded_batch * n_layers * P * P
    transcendentals = padded_batch * P
    bytes_accessed = 4 * (w_slab.size + b_slab.size
                          + padded_batch * in_dim
                          + padded_batch * n_actions)

    out = pl.pallas_call(
        _actor_kernel,
        out_shape=jax.ShapeDtypeStruct((padded_batch, n_actions), jnp.float32),
        grid_spec=pltpu.PrefetchScalarGridSpec(
            num_scalar_prefetch=0,
            grid=(n_steps,),
            in_specs=[
                # raw batch tile (last dim == full array dim -> (8,128) rule ok)
                pl.BlockSpec((bm, in_dim), lambda i: (i, 0)),
                # packed weights: constant index_map -> VMEM-resident, 1 DMA
                pl.BlockSpec((n_layers, P, P), lambda i: (0, 0, 0)),
                # packed biases: constant index_map -> VMEM-resident, 1 DMA
                pl.BlockSpec((b_slab.shape[0], P), lambda i: (0, 0)),
            ],
            # narrow output block: only real action lanes hit HBM
            out_specs=pl.BlockSpec((bm, n_actions), lambda i: (i, 0)),
        ),
        compiler_params=pltpu.CompilerParams(
            dimension_semantics=("parallel",)),
        cost_estimate=pl.CostEstimate(
            flops=int(flops),
            transcendentals=int(transcendentals),
            bytes_accessed=int(bytes_accessed)),
    )(x, w_slab, b_slab)

    return out[:batch]


def init_actor_params(key, input_dims, fc1_dims, fc2_dims, fc3_dims, fc4_dims,
                      n_actions):
    """Deterministic init mirroring the PyTorch __init__ (synthetic weights).

    hidden_init() in the reference uses weight.size()[0] == out_features for
    the limit (a quirk of that code), reproduced here.  Weights are stored
    already transposed to (in, out) for the kernel.
    """
    keys = jax.random.split(key, 10)

    def uniform(k, shape, lim):
        return jax.random.uniform(k, shape, jnp.float32, minval=-lim, maxval=lim)

    # fc1..fc3: uniform(+-1/sqrt(out_features))   (hidden_init quirk)
    w1 = uniform(keys[0], (input_dims, fc1_dims), 1.0 / jnp.sqrt(fc1_dims))
    w2 = uniform(keys[1], (fc1_dims, fc2_dims), 1.0 / jnp.sqrt(fc2_dims))
    w3 = uniform(keys[2], (fc2_dims, fc3_dims), 1.0 / jnp.sqrt(fc3_dims))
    # fc4: uniform(+-0.003)
    w4 = uniform(keys[3], (fc3_dims, fc4_dims), 0.003)
    # pi: default PyTorch Linear init uniform(+-1/sqrt(fan_in))
    wp = uniform(keys[4], (fc4_dims, n_actions), 1.0 / jnp.sqrt(fc4_dims))

    # biases: default PyTorch Linear init uniform(+-1/sqrt(fan_in))
    b1 = uniform(keys[5], (1, fc1_dims), 1.0 / jnp.sqrt(input_dims))
    b2 = uniform(keys[6], (1, fc2_dims), 1.0 / jnp.sqrt(fc1_dims))
    b3 = uniform(keys[7], (1, fc3_dims), 1.0 / jnp.sqrt(fc2_dims))
    b4 = uniform(keys[8], (1, fc4_dims), 1.0 / jnp.sqrt(fc3_dims))
    bp = uniform(keys[9], (1, n_actions), 1.0 / jnp.sqrt(fc4_dims))

    return dict(w1=w1, b1=b1, w2=w2, b2=b2, w3=w3, b3=b3, w4=w4, b4=b4,
                wp=wp, bp=bp)


def _reference_forward(state, p):
    """Pure-JAX reference for correctness check."""
    h = jax.nn.relu(state @ p["w1"] + p["b1"])
    h = jax.nn.relu(h @ p["w2"] + p["b2"])
    h = jax.nn.relu(h @ p["w3"] + p["b3"])
    h = jax.nn.relu(h @ p["w4"] + p["b4"])
    return jnp.tanh(h @ p["wp"] + p["bp"])


if __name__ == "__main__":
    # Small shapes consistent with the module signature.
    # (fc5_dims exists in __init__ args but is unused by forward; omitted.)
    # TODO(synk): optimizer/scheduler/checkpoint-IO/add_parameter_noise are
    # training-time utilities, not part of forward; not translated.
    batch = 8
    input_dims = 16
    fc1_dims, fc2_dims, fc3_dims, fc4_dims = 64, 64, 32, 32
    n_actions = 4

    key = jax.random.PRNGKey(0)
    k_x, k_p, k_x2 = jax.random.split(key, 3)

    state = jax.random.normal(k_x, (batch, input_dims), jnp.float32)
    params = init_actor_params(k_p, input_dims, fc1_dims, fc2_dims, fc3_dims,
                               fc4_dims, n_actions)
    w_slab, b_slab = pack_actor_params(params)

    # Small-batch path (grid = 1 tile).
    out = actor_forward(state, w_slab, b_slab, n_actions)
    out = jax.block_until_ready(out)
    ref = _reference_forward(state, params)
    assert out.shape == (batch, n_actions)
    assert jnp.allclose(out, ref, atol=1e-5, rtol=1e-5)

    # Non-multiple-of-tile batch exercising the gridded (>=2 step) path.
    big_batch = 300
    state_big = jax.random.normal(k_x2, (big_batch, input_dims), jnp.float32)
    out_big = actor_forward(state_big, w_slab, b_slab, n_actions)
    out_big = jax.block_until_ready(out_big)
    ref_big = _reference_forward(state_big, params)
    assert out_big.shape == (big_batch, n_actions)
    assert jnp.allclose(out_big, ref_big, atol=1e-5, rtol=1e-5)

    print("KERNEL_OK")
</pallas_src>

<mosaic_0001>
module attributes {stable_mosaic.version = 11 : i64} {
  func.func @_actor_kernel(%arg0: i32, %arg1: memref<8x16xf32, #tpu.memory_space<vmem>>, %arg2: memref<5x128x128xf32, #tpu.memory_space<vmem>>, %arg3: memref<8x128xf32, #tpu.memory_space<vmem>>, %arg4: memref<8x4xf32, #tpu.memory_space<vmem>>) attributes {dimension_semantics = [#tpu.dimension_semantics<parallel>], iteration_bounds = array<i64: 1>, scalar_prefetch = 0 : i64, scratch_operands = 0 : i64, tpu.core_type = #tpu.core_type<tc>, window_params = [{transform_indices = @transform_0, window_bounds = array<i64: 8, 16>}, {pipeline_mode = #tpu.pipeline_mode<synchronous>, transform_indices = @transform_1, window_bounds = array<i64: 5, 128, 128>}, {pipeline_mode = #tpu.pipeline_mode<synchronous>, transform_indices = @transform_2, window_bounds = array<i64: 8, 128>}, {transform_indices = @transform_3, window_bounds = array<i64: 8, 4>}]} {
    %c0 = arith.constant 0 : index
    %c0_0 = arith.constant 0 : index
    %0 = vector.load %arg1[%c0, %c0_0] : memref<8x16xf32, #tpu.memory_space<vmem>>, vector<8x16xf32>
    %cst = arith.constant 0.000000e+00 : f32
    %1 = vector.broadcast %cst : f32 to vector<8x112xf32>
    %2 = tpu.concatenate %0, %1 in 1 : vector<8x16xf32>, vector<8x112xf32> -> vector<8x128xf32>
    %c0_1 = arith.constant 0 : index
    %c0_2 = arith.constant 0 : index
    %c0_3 = arith.constant 0 : index
    %3 = vector.load %arg2[%c0_1, %c0_2, %c0_3] : memref<5x128x128xf32, #tpu.memory_space<vmem>>, vector<1x128x128xf32>
    %4 = vector.shape_cast %3 : vector<1x128x128xf32> to vector<128x128xf32>
    %cst_4 = arith.constant dense<0.000000e+00> : vector<8x128xf32>
    %5 = tpu.matmul %2, %4, %cst_4 {dimension_numbers = #tpu.dot_dimension_numbers<[1], [0], [0], [1], [0, 0, 1, 1], [], []>} : vector<8x128xf32>, vector<128x128xf32>, vector<8x128xf32> -> vector<8x128xf32>
    %c0_5 = arith.constant 0 : index
    %c0_6 = arith.constant 0 : index
    %6 = vector.load %arg3[%c0_5, %c0_6] : memref<8x128xf32, #tpu.memory_space<vmem>>, vector<1x128xf32>
    %7 = vector.broadcast %6 : vector<1x128xf32> to vector<8x128xf32>
    %8 = arith.addf %5, %7 : vector<8x128xf32>
    %cst_7 = arith.constant 0.000000e+00 : f32
    %9 = vector.broadcast %cst_7 : f32 to vector<8x128xf32>
    %10 = arith.maximumf %8, %9 : vector<8x128xf32>
    %c1 = arith.constant 1 : index
    %c0_8 = arith.constant 0 : index
    %c0_9 = arith.constant 0 : index
    %11 = vector.load %arg2[%c1, %c0_8, %c0_9] : memref<5x128x128xf32, #tpu.memory_space<vmem>>, vector<1x128x128xf32>
    %12 = vector.shape_cast %11 : vector<1x128x128xf32> to vector<128x128xf32>
    %cst_10 = arith.constant dense<0.000000e+00> : vector<8x128xf32>
    %13 = tpu.matmul %10, %12, %cst_10 {dimension_numbers = #tpu.dot_dimension_numbers<[1], [0], [0], [1], [0, 0, 1, 1], [], []>} : vector<8x128xf32>, vector<128x128xf32>, vector<8x128xf32> -> vector<8x128xf32>
    %c1_11 = arith.constant 1 : index
    %c0_12 = arith.constant 0 : index
    %14 = vector.load %arg3[%c1_11, %c0_12] : memref<8x128xf32, #tpu.memory_space<vmem>>, vector<1x128xf32>
    %15 = vector.broadcast %14 : vector<1x128xf32> to vector<8x128xf32>
    %16 = arith.addf %13, %15 : vector<8x128xf32>
    %cst_13 = arith.constant 0.000000e+00 : f32
    %17 = vector.broadcast %cst_13 : f32 to vector<8x128xf32>
    %18 = arith.maximumf %16, %17 : vector<8x128xf32>
    %c2 = arith.constant 2 : index
    %c0_14 = arith.constant 0 : index
    %c0_15 = arith.constant 0 : index
    %19 = vector.load %arg2[%c2, %c0_14, %c0_15] : memref<5x128x128xf32, #tpu.memory_space<vmem>>, vector<1x128x128xf32>
    %20 = vector.shape_cast %19 : vector<1x128x128xf32> to vector<128x128xf32>
    %cst_16 = arith.constant dense<0.000000e+00> : vector<8x128xf32>
    %21 = tpu.matmul %18, %20, %cst_16 {dimension_numbers = #tpu.dot_dimension_numbers<[1], [0], [0], [1], [0, 0, 1, 1], [], []>} : vector<8x128xf32>, vector<128x128xf32>, vector<8x128xf32> -> vector<8x128xf32>
    %c2_17 = arith.constant 2 : index
    %c0_18 = arith.constant 0 : index
    %22 = vector.load %arg3[%c2_17, %c0_18] : memref<8x128xf32, #tpu.memory_space<vmem>>, vector<1x128xf32>
    %23 = vector.broadcast %22 : vector<1x128xf32> to vector<8x128xf32>
    %24 = arith.addf %21, %23 : vector<8x128xf32>
    %cst_19 = arith.constant 0.000000e+00 : f32
    %25 = vector.broadcast %cst_19 : f32 to vector<8x128xf32>
    %26 = arith.maximumf %24, %25 : vector<8x128xf32>
    %c3 = arith.constant 3 : index
    %c0_20 = arith.constant 0 : index
    %c0_21 = arith.constant 0 : index
    %27 = vector.load %arg2[%c3, %c0_20, %c0_21] : memref<5x128x128xf32, #tpu.memory_space<vmem>>, vector<1x128x128xf32>
    %28 = vector.shape_cast %27 : vector<1x128x128xf32> to vector<128x128xf32>
    %cst_22 = arith.constant dense<0.000000e+00> : vector<8x128xf32>
    %29 = tpu.matmul %26, %28, %cst_22 {dimension_numbers = #tpu.dot_dimension_numbers<[1], [0], [0], [1], [0, 0, 1, 1], [], []>} : vector<8x128xf32>, vector<128x128xf32>, vector<8x128xf32> -> vector<8x128xf32>
    %c3_23 = arith.constant 3 : index
    %c0_24 = arith.constant 0 : index
    %30 = vector.load %arg3[%c3_23, %c0_24] : memref<8x128xf32, #tpu.memory_space<vmem>>, vector<1x128xf32>
    %31 = vector.broadcast %30 : vector<1x128xf32> to vector<8x128xf32>
    %32 = arith.addf %29, %31 : vector<8x128xf32>
    %cst_25 = arith.constant 0.000000e+00 : f32
    %33 = vector.broadcast %cst_25 : f32 to vector<8x128xf32>
    %34 = arith.maximumf %32, %33 : vector<8x128xf32>
    %c4 = arith.constant 4 : index
    %c0_26 = arith.constant 0 : index
    %c0_27 = arith.constant 0 : index
    %35 = vector.load %arg2[%c4, %c0_26, %c0_27] : memref<5x128x128xf32, #tpu.memory_space<vmem>>, vector<1x128x128xf32>
    %36 = vector.shape_cast %35 : vector<1x128x128xf32> to vector<128x128xf32>
    %cst_28 = arith.constant dense<0.000000e+00> : vector<8x128xf32>
    %37 = tpu.matmul %34, %36, %cst_28 {dimension_numbers = #tpu.dot_dimension_numbers<[1], [0], [0], [1], [0, 0, 1, 1], [], []>} : vector<8x128xf32>, vector<128x128xf32>, vector<8x128xf32> -> vector<8x128xf32>
    %c4_29 = arith.constant 4 : index
    %c0_30 = arith.constant 0 : index
    %38 = vector.load %arg3[%c4_29, %c0_30] : memref<8x128xf32, #tpu.memory_space<vmem>>, vector<1x128xf32>
    %39 = vector.broadcast %38 : vector<1x128xf32> to vector<8x128xf32>
    %40 = arith.addf %37, %39 : vector<8x128xf32>
    %41 = math.tanh %40 : vector<8x128xf32>
    %42 = vector.extract_strided_slice %41 {offsets = [0, 0], sizes = [8, 4], strides = [1, 1]} : vector<8x128xf32> to vector<8x4xf32>
    %c0_31 = arith.constant 0 : index
    %c0_32 = arith.constant 0 : index
    %43 = vector.load %arg4[%c0_31, %c0_32] : memref<8x4xf32, #tpu.memory_space<vmem>>, vector<8x4xf32>
    tpu.vector_store %arg4[%c0_31, %c0_32], %42 {strides = array<i32>} : memref<8x4xf32, #tpu.memory_space<vmem>>, vector<8x4xf32>,
    return
  }
  func.func @transform_0(%arg0: i32) -> (i32, i32) {
    %c0_i32 = arith.constant 0 : i32
    %c0_i32_0 = arith.constant 0 : i32
    return %arg0, %c0_i32 : i32, i32
  }
  func.func @transform_1(%arg0: i32) -> (i32, i32, i32) {
    %c0_i32 = arith.constant 0 : i32
    %c0_i32_0 = arith.constant 0 : i32
    %c0_i32_1 = arith.constant 0 : i32
    %c0_i32_2 = arith.constant 0 : i32
    return %c0_i32, %c0_i32_0, %c0_i32_1 : i32, i32, i32
  }
  func.func @transform_2(%arg0: i32) -> (i32, i32) {
    %c0_i32 = arith.constant 0 : i32
    %c0_i32_0 = arith.constant 0 : i32
    %c0_i32_1 = arith.constant 0 : i32
    return %c0_i32, %c0_i32_0 : i32, i32
  }
  func.func @transform_3(%arg0: i32) -> (i32, i32) {
    %c0_i32 = arith.constant 0 : i32
    %c0_i32_0 = arith.constant 0 : i32
    return %arg0, %c0_i32 : i32, i32
  }
}

</mosaic_0001>

<bundles_post_ra>
// kernel: actor_forward.1
= control target key start
LH: loop header
LB: loop body
LE: loop exit
PB: predicated region body
PF: predicated region fallthrough
CT: control target
= control target key end

     0   :  { %8 = vsyncpa [#allocation3], 0  ;;  %s994_s0 = inlined_call_operand.hbm [shape: f32[8,16], index: 0, kind: input, shape index: {}]   ;;  %s995_s1 = inlined_call_operand.hbm [shape: f32[5,128,128], index: 1, kind: input, shape index: {}]   ;;  %s996_s2 = inlined_call_operand.hbm [shape: f32[8,128], index: 2, kind: input, shape index: {}]   ;;  %s997_s3 = inlined_call_operand.vmem [shape: f32[8,4], index: 3, kind: output, shape index: {}]  }
   0x1   :  { %9 = vsyncpa [#allocation5], 0  ;;  %s865_s12 = smov [#allocation4]  }
   0x2   :  { %s25_s13 = sshll.u32 %s865_s12, 4  ;;  %s26_s13 = int_to_ptr.vmem [resolvable:$true] %s25_s13 }
   0x3   :  { %s809_s14 = scalar_lea.vmem %s26_s13, 10240  ;;  %p814_p1 = scmp.lt.s32.totalorder %s26_s13, %s26_s13 }
   0x4   :  { %p810_p0 = scmp.ne.s32.totalorder %s26_s13, %s809_s14  ;;  %p815_p2 = scmp.lt.s32.totalorder %s809_s14, %s809_s14 }
   0x6   :  { %p816_p3 = por %p815_p2, %p814_p1 }
   0x8   :  { %p817_p4 = pnand %p816_p3, %p810_p0 }
   0xa   :  { %820 = shalt.err (!%p817_p4)
}
   0xb   :  { %s866_s15 = smov 128   ;;  %s867_s16 = smov 8  }
   0xc   :  { %31 = dma.hbm_to_vmem [thread:$0]  %s995_s1, 10240, %s26_s13, [#allocation5], %s866_s15, %s866_s15, %s867_s16  }
   0xd   :  { %s868_s19 = smov [#allocation2]   ;;  %s869_s21 = smov [#allocation6]  }
   0xe   :  { %s16_s20 = sshll.u32 %s868_s19, 4  ;;  %s38_s22 = sshll.u32 %s869_s21, 4  ;;  %s17_s20 = int_to_ptr.vmem [resolvable:$true] %s16_s20  ;;  %s39_s22 = int_to_ptr.vmem [resolvable:$true] %s38_s22 }
   0xf   :  { %s829_s23 = scalar_lea.vmem %s17_s20, 128  ;;  %p834_p6 = scmp.lt.s32.totalorder %s17_s20, %s17_s20 }
  0x10   :  { %p830_p5 = scmp.ne.s32.totalorder %s17_s20, %s829_s23  ;;  %p835_p7 = scmp.lt.s32.totalorder %s829_s23, %s829_s23 }
  0x12   :  { %p836_p8 = por %p835_p7, %p834_p6 }
  0x14   :  { %p837_p9 = pnand %p836_p8, %p830_p5 }
  0x16   :  { %840 = shalt.err (!%p837_p9)
}
  0x17   :  { %19 = dma.hbm_to_vmem [thread:$0]  %s994_s0, 128, %s17_s20, [#allocation3]  }
  0x18   :  { %s849_s26 = scalar_lea.vmem %s39_s22, 128  ;;  %p854_p11 = scmp.lt.s32.totalorder %s39_s22, %s39_s22 }
  0x19   :  { %p850_p10 = scmp.ne.s32.totalorder %s39_s22, %s849_s26  ;;  %p855_p12 = scmp.lt.s32.totalorder %s849_s26, %s849_s26 }
  0x1b   :  { %p856_p13 = por %p855_p12, %p854_p11 }
  0x1d   :  { %p857_p0 = pnand %p856_p13, %p850_p10 }
  0x1f   :  { %860 = shalt.err (!%p857_p0)
}
  0x20   :  { %41 = dma.hbm_to_vmem [thread:$0]  %s996_s2, 128, %s39_s22, [#allocation5]  }
  0x21   :  { %861 = dma.done.wait [#allocation3], 128  }
  0x22   :  { %862 = vsyncadd [#allocation3], 4294967168 }
  0x23   :  { %863 = dma.done.wait [#allocation5], 10368  }
  0x24   :  { %864 = vsyncadd [#allocation5], 4294956928  ;;  %v870_v0 = vmov 0.0   ;;  %vm871_vm0 = vmmov 0   ;;  %v69_v1 = vld [vmem:[#allocation4 + $0x78] sm:$0xff]  ;;  %v68_v2 = vld [vmem:[#allocation4 + $0x70] sm:$0xff] }
  0x25   :  { %617 = vmatprep.subr.mxu0 %v870_v0  ;;  %649 = vmatprep.mubr.msk.f32.mxu0 %vm871_vm0, %v870_v0  ;;  %v67_v3 = vld [vmem:[#allocation4 + $0x68] sm:$0xff]  ;;  %v66_v4 = vld [vmem:[#allocation4 + $0x60] sm:$0xff]  ;;  %v162_v5 = vld [vmem:[#allocation4 + $0xf8] sm:$0xff]  ;;  %vm52_vm1 = vcmask 130048   ;;  %vm518_vm2 = vcmask 31744  }
  0x26   :  { %652 = vmatprep.subr.mxu1 %v870_v0  ;;  %684 = vmatprep.mubr.msk.f32.mxu1 %vm871_vm0, %v870_v0  ;;  %v65_v6 = vld [vmem:[#allocation4 + $0x58] sm:$0xff]  ;;  %v161_v7 = vld [vmem:[#allocation4 + $0xf0] sm:$0xff]  ;;  %v160_v8 = vld [vmem:[#allocation4 + $0xe8] sm:$0xff] }
  0x27   :  { %618 = vmatpush3.msra.mxu0 %v69_v1  ;;  %653 = vmatpush3.msra.mxu1 %v162_v5  ;;  %v64_v9 = vld [vmem:[#allocation4 + $0x50] sm:$0xff]  ;;  %v159_v10 = vld [vmem:[#allocation4 + $0xe0] sm:$0xff]  ;;  %v63_v11 = vld [vmem:[#allocation4 + $0x48] sm:$0xff] }
  0x28   :  { %619 = vmatprep.subr.mxu0 %v870_v0  ;;  %654 = vmatprep.subr.mxu1 %v870_v0  ;;  %v158_v12 = vld [vmem:[#allocation4 + $0xd8] sm:$0xff]  ;;  %v62_v13 = vld [vmem:[#allocation4 + $0x40] sm:$0xff]  ;;  %v157_v14 = vld [vmem:[#allocation4 + $0xd0] sm:$0xff] }
  0x29   :  { %620 = vmatpush3.msra.mxu0 %v68_v2  ;;  %655 = vmatpush3.msra.mxu1 %v161_v7  ;;  %v61_v15 = vld [vmem:[#allocation4 + $0x38] sm:$0xff]  ;;  %v156_v16 = vld [vmem:[#allocation4 + $0xc8] sm:$0xff]  ;;  %v60_v17 = vld [vmem:[#allocation4 + $0x30] sm:$0xff] }
  0x2a   :  { %621 = vmatprep.subr.mxu0 %v870_v0  ;;  %656 = vmatprep.subr.mxu1 %v870_v0  ;;  %v155_v18 = vld [vmem:[#allocation4 + $0xc0] sm:$0xff]  ;;  %v59_v19 = vld [vmem:[#allocation4 + $0x28] sm:$0xff]  ;;  %v154_v20 = vld [vmem:[#allocation4 + $0xb8] sm:$0xff] }
  0x2b   :  { %622 = vmatpush3.msra.mxu0 %v67_v3  ;;  %657 = vmatpush3.msra.mxu1 %v160_v8  ;;  %v58_v21 = vld [vmem:[#allocation4 + $0x20] sm:$0xff]  ;;  %v153_v22 = vld [vmem:[#allocation4 + $0xb0] sm:$0xff]  ;;  %v57_v23 = vld [vmem:[#allocation4 + $0x18] sm:$0xff] }
  0x2c   :  { %623 = vmatprep.subr.mxu0 %v870_v0  ;;  %658 = vmatprep.subr.mxu1 %v870_v0  ;;  %v152_v24 = vld [vmem:[#allocation4 + $0xa8] sm:$0xff]  ;;  %v56_v25 = vld [vmem:[#allocation4 + $0x10] sm:$0xff]  ;;  %v151_v26 = vld [vmem:[#allocation4 + $0xa0] sm:$0xff] }
  0x2d   :  { %624 = vmatpush3.msra.mxu0 %v66_v4  ;;  %659 = vmatpush3.msra.mxu1 %v159_v10  ;;  %v55_v27 = vld [vmem:[#allocation4 + $0x8] sm:$0xff]  ;;  %v150_v28 = vld [vmem:[#allocation4 + $0x98] sm:$0xff]  ;;  %v54_v29 = vld [vmem:[#allocation4] sm:$0xff] }
  0x2e   :  { %625 = vmatprep.subr.mxu0 %v870_v0  ;;  %660 = vmatprep.subr.mxu1 %v870_v0  ;;  %v51_v30 = vld [vmem:[#allocation2] sm:$0xff]  ;;  %v149_v31 = vld [vmem:[#allocation4 + $0x90] sm:$0xff]  ;;  %v148_v32 = vld [vmem:[#allocation4 + $0x88] sm:$0xff] }
  0x2f   :  { %626 = vmatpush3.msra.mxu0 %v65_v6  ;;  %661 = vmatpush3.msra.mxu1 %v158_v12  ;;  %v147_v33 = vld [vmem:[#allocation4 + $0x80] sm:$0xff]  ;;  %v255_v34 = vld [vmem:[#allocation4 + $0x178] sm:$0xff]  ;;  %v254_v35 = vld [vmem:[#allocation4 + $0x170] sm:$0xff] }
  0x30   :  { %627 = vmatprep.subr.mxu0 %v870_v0  ;;  %662 = vmatprep.subr.mxu1 %v870_v0  ;;  %v253_v36 = vld [vmem:[#allocation4 + $0x168] sm:$0xff]  ;;  %v252_v37 = vld [vmem:[#allocation4 + $0x160] sm:$0xff]  ;;  %v251_v38 = vld [vmem:[#allocation4 + $0x158] sm:$0xff] }
  0x31   :  { %628 = vmatpush3.msra.mxu0 %v64_v9  ;;  %663 = vmatpush3.msra.mxu1 %v157_v14  ;;  %v250_v39 = vld [vmem:[#allocation4 + $0x150] sm:$0xff]  ;;  %v249_v40 = vld [vmem:[#allocation4 + $0x148] sm:$0xff]  ;;  %v248_v41 = vld [vmem:[#allocation4 + $0x140] sm:$0xff] }
  0x32   :  { %629 = vmatprep.subr.mxu0 %v870_v0  ;;  %664 = vmatprep.subr.mxu1 %v870_v0  ;;  %v247_v42 = vld [vmem:[#allocation4 + $0x138] sm:$0xff]  ;;  %v246_v43 = vld [vmem:[#allocation4 + $0x130] sm:$0xff]  ;;  %v245_v44 = vld [vmem:[#allocation4 + $0x128] sm:$0xff] }
  0x33   :  { %630 = vmatpush3.msra.mxu0 %v63_v11  ;;  %665 = vmatpush3.msra.mxu1 %v156_v16  ;;  %v244_v45 = vld [vmem:[#allocation4 + $0x120] sm:$0xff]  ;;  %v243_v46 = vld [vmem:[#allocation4 + $0x118] sm:$0xff]  ;;  %v242_v52 = vld [vmem:[#allocation4 + $0x110] sm:$0xff] }
  0x34   :  { %631 = vmatprep.subr.mxu0 %v870_v0  ;;  %666 = vmatprep.subr.mxu1 %v870_v0  ;;  %v526_v47 = vld [vmem:[#allocation6] ss:$0 sm:$0xff]  ;;  %v241_v53 = vld [vmem:[#allocation4 + $0x108] sm:$0xff]  ;;  %v348_v55 = vld [vmem:[#allocation4 + $0x1f8] sm:$0xff] }
  0x35   :  { %632 = vmatpush3.msra.mxu0 %v62_v13  ;;  %667 = vmatpush3.msra.mxu1 %v155_v18  ;;  %v240_v54 = vld [vmem:[#allocation4 + $0x100] sm:$0xff]  ;;  %v347_v56 = vld [vmem:[#allocation4 + $0x1f0] sm:$0xff]  ;;  %v346_v57 = vld [vmem:[#allocation4 + $0x1e8] sm:$0xff] }
  0x36   :  { %633 = vmatprep.subr.mxu0 %v870_v0  ;;  %668 = vmatprep.subr.mxu1 %v870_v0  ;;  %v345_v58 = vld [vmem:[#allocation4 + $0x1e0] sm:$0xff]  ;;  %v344_v59 = vld [vmem:[#allocation4 + $0x1d8] sm:$0xff]  ;;  %v343_v60 = vld [vmem:[#allocation4 + $0x1d0] sm:$0xff] }
  0x37   :  { %634 = vmatpush3.msra.mxu0 %v61_v15  ;;  %669 = vmatpush3.msra.mxu1 %v154_v20  ;;  %v342_v61 = vld [vmem:[#allocation4 + $0x1c8] sm:$0xff]  ;;  %v341_v62 = vld [vmem:[#allocation4 + $0x1c0] sm:$0xff]  ;;  %v340_v63 = vld [vmem:[#allocation4 + $0x1b8] sm:$0xff] }
  0x38   :  { %635 = vmatprep.subr.mxu0 %v870_v0  ;;  %670 = vmatprep.subr.mxu1 %v870_v0  ;;  %v339_v1 = vld [vmem:[#allocation4 + $0x1b0] sm:$0xff]  ;;  %v338_v2 = vld [vmem:[#allocation4 + $0x1a8] sm:$0xff]  ;;  %v337_v3 = vld [vmem:[#allocation4 + $0x1a0] sm:$0xff] }
  0x39   :  { %636 = vmatpush3.msra.mxu0 %v60_v17  ;;  %671 = vmatpush3.msra.mxu1 %v153_v22  ;;  %v336_v4 = vld [vmem:[#allocation4 + $0x198] sm:$0xff]  ;;  %v528_v5 = vld [vmem:[#allocation6 + $0x1] ss:$0 sm:$0xff]  ;;  %v335_v10 = vld [vmem:[#allocation4 + $0x190] sm:$0xff] }
  0x3a   :  { %637 = vmatprep.subr.mxu0 %v870_v0  ;;  %672 = vmatprep.subr.mxu1 %v870_v0  ;;  %v334_v11 = vld [vmem:[#allocation4 + $0x188] sm:$0xff]  ;;  %v333_v12 = vld [vmem:[#allocation4 + $0x180] sm:$0xff]  ;;  %v441_v13 = vld [vmem:[#allocation4 + $0x278] sm:$0xff] }
  0x3b   :  { %638 = vmatpush3.msra.mxu0 %v59_v19  ;;  %673 = vmatpush3.msra.mxu1 %v152_v24  ;;  %v440_v14 = vld [vmem:[#allocation4 + $0x270] sm:$0xff]  ;;  %v439_v15 = vld [vmem:[#allocation4 + $0x268] sm:$0xff]  ;;  %v438_v16 = vld [vmem:[#allocation4 + $0x260] sm:$0xff] }
  0x3c   :  { %639 = vmatprep.subr.mxu0 %v870_v0  ;;  %674 = vmatprep.subr.mxu1 %v870_v0  ;;  %v437_v17 = vld [vmem:[#allocation4 + $0x258] sm:$0xff]  ;;  %v436_v18 = vld [vmem:[#allocation4 + $0x250] sm:$0xff]  ;;  %v435_v19 = vld [vmem:[#allocation4 + $0x248] sm:$0xff] }
  0x3d   :  { %640 = vmatpush3.msra.mxu0 %v58_v21  ;;  %675 = vmatpush3.msra.mxu1 %v151_v26  ;;  %v434_v20 = vld [vmem:[#allocation4 + $0x240] sm:$0xff]  ;;  %v433_v21 = vld [vmem:[#allocation4 + $0x238] sm:$0xff]  ;;  %v432_v22 = vld [vmem:[#allocation4 + $0x230] sm:$0xff] }
  0x3e   :  { %641 = vmatprep.subr.mxu0 %v870_v0  ;;  %676 = vmatprep.subr.mxu1 %v870_v0  ;;  %v430_v24 = vld [vmem:[#allocation4 + $0x220] sm:$0xff] }
  0x3f   :  { %642 = vmatpush3.msra.mxu0 %v57_v23  ;;  %677 = vmatpush3.msra.mxu1 %v150_v28  ;;  %v431_v23 = vld [vmem:[#allocation4 + $0x228] sm:$0xff]  ;;  %v529_v26 = vld [vmem:[#allocation6 + $0x2] ss:$0 sm:$0xff] }
  0x40   :  { %643 = vmatprep.subr.mxu0 %v870_v0  ;;  %678 = vmatprep.subr.mxu1 %v870_v0 }
  0x41   :  { %644 = vmatpush3.msra.mxu0 %v56_v25  ;;  %679 = vmatpush3.msra.mxu1 %v149_v31  ;;  %v429_v25 = vld [vmem:[#allocation4 + $0x218] sm:$0xff]  ;;  %v428_v31 = vld [vmem:[#allocation4 + $0x210] sm:$0xff] }
  0x42   :  { %645 = vmatprep.subr.mxu0 %v870_v0  ;;  %680 = vmatprep.subr.mxu1 %v870_v0 }
  0x43   :  { %646 = vmatpush3.msra.mxu0 %v55_v27  ;;  %681 = vmatpush3.msra.mxu1 %v148_v32  ;;  %v427_v32 = vld [vmem:[#allocation4 + $0x208] sm:$0xff] }
  0x44   :  { %647 = vmatprep.subr.mxu0 %v870_v0  ;;  %682 = vmatprep.subr.mxu1 %v870_v0 }
  0x45   :  { %648 = vmatpush3.msra.mxu0 %v54_v29  ;;  %683 = vmatpush3.msra.mxu1 %v147_v33  ;;  %v426_v33 = vld [vmem:[#allocation4 + $0x200] sm:$0xff] }
  0x46   :  { %650 = vmatmul.mubr.msk.f32.vlgmr.msra.gmra.mxu0 %vm52_vm1, %v51_v30  ;;  %687 = vmatprep.subr.mxu0 %v870_v0 }
  0x47   :  { %719 = vmatprep.mubr.msk.f32.mxu0 %vm871_vm0, %v870_v0  ;;  %722 = vmatprep.subr.mxu1 %v870_v0 }
  0x48   :  { %688 = vmatpush3.msra.mxu0 %v255_v34  ;;  %v530_v34 = vld [vmem:[#allocation6 + $0x3] ss:$0 sm:$0xff] }
  0x49   :  { %689 = vmatprep.subr.mxu0 %v870_v0 }
  0x4a   :  { %690 = vmatpush3.msra.mxu0 %v254_v35 }
  0x4b   :  { %691 = vmatprep.subr.mxu0 %v870_v0 }
  0x4c   :  { %692 = vmatpush3.msra.mxu0 %v253_v36 }
  0x4d   :  { %693 = vmatprep.subr.mxu0 %v870_v0 }
  0x4e   :  { %694 = vmatpush3.msra.mxu0 %v252_v37 }
  0x4f   :  { %695 = vmatprep.subr.mxu0 %v870_v0 }
  0x50   :  { %696 = vmatpush3.msra.mxu0 %v251_v38 }
  0x51   :  { %697 = vmatprep.subr.mxu0 %v870_v0 }
  0x52   :  { %698 = vmatpush3.msra.mxu0 %v250_v39  ;;  %v531_v39 = vld [vmem:[#allocation6 + $0x4] ss:$0 sm:$0xff] }
  0x53   :  { %699 = vmatprep.subr.mxu0 %v870_v0 }
  0x54   :  { %700 = vmatpush3.msra.mxu0 %v249_v40 }
  0x55   :  { %701 = vmatprep.subr.mxu0 %v870_v0 }
  0x56   :  { %702 = vmatpush3.msra.mxu0 %v248_v41 }
  0x57   :  { %703 = vmatprep.subr.mxu0 %v870_v0 }
  0x58   :  { %704 = vmatpush3.msra.mxu0 %v247_v42 }
  0x59   :  { %705 = vmatprep.subr.mxu0 %v870_v0 }
  0x5a   :  { %706 = vmatpush3.msra.mxu0 %v246_v43 }
  0x5b   :  { %707 = vmatprep.subr.mxu0 %v870_v0 }
  0x5c   :  { %708 = vmatpush3.msra.mxu0 %v245_v44 }
  0x5d   :  { %709 = vmatprep.subr.mxu0 %v870_v0 }
  0x5e   :  { %710 = vmatpush3.msra.mxu0 %v244_v45 }
  0x5f   :  { %711 = vmatprep.subr.mxu0 %v870_v0 }
  0x60   :  { %712 = vmatpush3.msra.mxu0 %v243_v46 }
  0x61   :  { %713 = vmatprep.subr.mxu0 %v870_v0 }
  0x62   :  { %714 = vmatpush3.msra.mxu0 %v242_v52 }
  0x63   :  { %715 = vmatprep.subr.mxu0 %v870_v0 }
  0x64   :  { %716 = vmatpush3.msra.mxu0 %v241_v53 }
  0x65   :  { %717 = vmatprep.subr.mxu0 %v870_v0 }
  0x66   :  { %718 = vmatpush3.msra.mxu0 %v240_v54 }
  0x67   :  { %757 = vmatprep.subr.mxu0 %v870_v0 }
 0x106   :  { %v141_v48 = vpop.f32.mrf.mxu0 }
 0x107   :  { %v142_v49 = vadd.f32 %v526_v47, %v141_v48 }
 0x108   :  { %v651_v50 = vpop.f32.mrf.mxu0 }
 0x109   :  { %v145_v51 = vmax.f32 %v142_v49, 0.0 }
 0x10b   :  { %685 = vmatmul.mubr.f32.vlgmr.msra.gmra.mxu1 %v145_v51 }
 0x10c   :  { %754 = vmatprep.mubr.msk.f32.mxu1 %vm871_vm0, %v870_v0  ;;  %723 = vmatpush3.msra.mxu1 %v348_v55 }
 0x10d   :  { %724 = vmatprep.subr.mxu1 %v870_v0 }
 0x10e   :  { %725 = vmatpush3.msra.mxu1 %v347_v56 }
 0x10f   :  { %726 = vmatprep.subr.mxu1 %v870_v0 }
 0x110   :  { %727 = vmatpush3.msra.mxu1 %v346_v57 }
 0x111   :  { %728 = vmatprep.subr.mxu1 %v870_v0 }
 0x112   :  { %729 = vmatpush3.msra.mxu1 %v345_v58 }
 0x113   :  { %730 = vmatprep.subr.mxu1 %v870_v0 }
 0x114   :  { %731 = vmatpush3.msra.mxu1 %v344_v59 }
 0x115   :  { %732 = vmatprep.subr.mxu1 %v870_v0 }
 0x116   :  { %733 = vmatpush3.msra.mxu1 %v343_v60 }
 0x117   :  { %734 = vmatprep.subr.mxu1 %v870_v0 }
 0x118   :  { %735 = vmatpush3.msra.mxu1 %v342_v61 }
 0x119   :  { %736 = vmatprep.subr.mxu1 %v870_v0 }
 0x11a   :  { %737 = vmatpush3.msra.mxu1 %v341_v62 }
 0x11b   :  { %738 = vmatprep.subr.mxu1 %v870_v0 }
 0x11c   :  { %739 = vmatpush3.msra.mxu1 %v340_v63 }
 0x11d   :  { %740 = vmatprep.subr.mxu1 %v870_v0 }
 0x11e   :  { %741 = vmatpush3.msra.mxu1 %v339_v1 }
 0x11f   :  { %742 = vmatprep.subr.mxu1 %v870_v0 }
 0x120   :  { %743 = vmatpush3.msra.mxu1 %v338_v2 }
 0x121   :  { %744 = vmatprep.subr.mxu1 %v870_v0 }
 0x122   :  { %745 = vmatpush3.msra.mxu1 %v337_v3 }
 0x123   :  { %746 = vmatprep.subr.mxu1 %v870_v0 }
 0x124   :  { %747 = vmatpush3.msra.mxu1 %v336_v4 }
 0x125   :  { %748 = vmatprep.subr.mxu1 %v870_v0 }
 0x126   :  { %749 = vmatpush3.msra.mxu1 %v335_v10 }
 0x127   :  { %750 = vmatprep.subr.mxu1 %v870_v0 }
 0x128   :  { %751 = vmatpush3.msra.mxu1 %v334_v11 }
 0x129   :  { %752 = vmatprep.subr.mxu1 %v870_v0 }
 0x12a   :  { %753 = vmatpush3.msra.mxu1 %v333_v12 }
 0x1cb   :  { %v234_v6 = vpop.f32.mrf.mxu1 }
 0x1cc   :  { %v235_v7 = vadd.f32 %v528_v5, %v234_v6 }
 0x1cd   :  { %v686_v8 = vpop.f32.mrf.mxu1 }
 0x1ce   :  { %v238_v9 = vmax.f32 %v235_v7, 0.0 }
 0x1d0   :  { %720 = vmatmul.mubr.f32.vlgmr.msra.gmra.mxu0 %v238_v9 }
 0x1d1   :  { %789 = vmatprep.mubr.msk.f32.mxu0 %vm871_vm0, %v870_v0  ;;  %758 = vmatpush3.msra.mxu0 %v441_v13 }
 0x1d2   :  { %759 = vmatprep.subr.mxu0 %v870_v0 }
 0x1d3   :  { %760 = vmatpush3.msra.mxu0 %v440_v14 }
 0x1d4   :  { %761 = vmatprep.subr.mxu0 %v870_v0 }
 0x1d5   :  { %762 = vmatpush3.msra.mxu0 %v439_v15 }
 0x1d6   :  { %763 = vmatprep.subr.mxu0 %v870_v0 }
 0x1d7   :  { %764 = vmatpush3.msra.mxu0 %v438_v16 }
 0x1d8   :  { %765 = vmatprep.subr.mxu0 %v870_v0 }
 0x1d9   :  { %766 = vmatpush3.msra.mxu0 %v437_v17 }
 0x1da   :  { %767 = vmatprep.subr.mxu0 %v870_v0 }
 0x1db   :  { %768 = vmatpush3.msra.mxu0 %v436_v18 }
 0x1dc   :  { %769 = vmatprep.subr.mxu0 %v870_v0 }
 0x1dd   :  { %770 = vmatpush3.msra.mxu0 %v435_v19 }
 0x1de   :  { %771 = vmatprep.subr.mxu0 %v870_v0 }
 0x1df   :  { %772 = vmatpush3.msra.mxu0 %v434_v20 }
 0x1e0   :  { %773 = vmatprep.subr.mxu0 %v870_v0 }
 0x1e1   :  { %774 = vmatpush3.msra.mxu0 %v433_v21 }
 0x1e2   :  { %775 = vmatprep.subr.mxu0 %v870_v0 }
 0x1e3   :  { %776 = vmatpush3.msra.mxu0 %v432_v22 }
 0x1e4   :  { %777 = vmatprep.subr.mxu0 %v870_v0 }
 0x1e5   :  { %778 = vmatpush3.msra.mxu0 %v431_v23 }
 0x1e6   :  { %779 = vmatprep.subr.mxu0 %v870_v0 }
 0x1e7   :  { %780 = vmatpush3.msra.mxu0 %v430_v24 }
 0x1e8   :  { %781 = vmatprep.subr.mxu0 %v870_v0 }
 0x1e9   :  { %782 = vmatpush3.msra.mxu0 %v429_v25 }
 0x1ea   :  { %783 = vmatprep.subr.mxu0 %v870_v0 }
 0x1eb   :  { %784 = vmatpush3.msra.mxu0 %v428_v31 }
 0x1ec   :  { %785 = vmatprep.subr.mxu0 %v870_v0 }
 0x1ed   :  { %786 = vmatpush3.msra.mxu0 %v427_v32 }
 0x1ee   :  { %787 = vmatprep.subr.mxu0 %v870_v0 }
 0x1ef   :  { %788 = vmatpush3.msra.mxu0 %v426_v33 }
 0x290   :  { %v327_v27 = vpop.f32.mrf.mxu0 }
 0x291   :  { %v328_v28 = vadd.f32 %v529_v26, %v327_v27 }
 0x292   :  { %v721_v29 = vpop.f32.mrf.mxu0 }
 0x293   :  { %v331_v30 = vmax.f32 %v328_v28, 0.0 }
 0x295   :  { %755 = vmatmul.mubr.f32.vlgmr.msra.gmra.mxu1 %v331_v30 }
 0x355   :  { %v420_v35 = vpop.f32.mrf.mxu1 }
 0x356   :  { %v421_v36 = vadd.f32 %v530_v34, %v420_v35 }
 0x357   :  { %v756_v37 = vpop.f32.mrf.mxu1 }
 0x358   :  { %v424_v38 = vmax.f32 %v421_v36, 0.0 }
 0x35a   :  { %790 = vmatmul.mubr.f32.vlgmr.msra.gmra.mxu0 %v424_v38 }
 0x41a   :  { %v513_v40 = vpop.f32.mrf.mxu0 }
 0x41b   :  { %v514_v41 = vadd.f32 %v531_v39, %v513_v40 }
 0x41c   :  { %v791_v42 = vpop.f32.mrf.mxu0 }
 0x41d   :  { %799 = vtanh.f32 %v514_v41 }
 0x42a   :  { %v800_v43 = vpop.eup %799 }
 0x42b   :  { %519 = vst.msk [vmem:[%s997_s3] sm:$0xff] %vm518_vm2, %v800_v43 }
 0x42c   :  { %524 = vsyncpa [#allocation3], 1 }
 0x42d   :  { %525 = vsyncpa [#allocation5], 1 }

</bundles_post_ra>
